<compile_context>
chip_gen: v6e
topology: v6e:2x2x1
jax: 0.10.0
libtpu: 0.0.40
codegen_flags: <defaults>
</compile_context>

<pallas_src>
import jax
import jax.numpy as jnp
import numpy as np
from jax.experimental import pallas as pl
from jax.experimental.pallas import tpu as pltpu


_LANE = 128                       # lane (last-dim) quantum
_MAX_TILE_M = 1024                # measured sweet spot for row tiles
_VMEM_TILE_BUDGET = 24 << 20      # keep well under v7x's 64 MiB physical VMEM


def _round_up(x, m):
    return ((x + m - 1) // m) * m


def _sine_layer_kernel(x_ref, wt_ref, b_ref, o_ref):
    # MXU matmul (bf16 or f32 operands, f32 accumulation), then bias add and
    # sin in f32 on VPU/EUP.  omega_0 is already folded into wt/b.
    z = jnp.dot(x_ref[...], wt_ref[...], preferred_element_type=jnp.float32)
    z = z + b_ref[...]                       # [tile_m, N_pad] + [1, N_pad]
    o_ref[...] = jnp.sin(z).astype(o_ref.dtype)


def sine_layer_forward(x, weight, bias, omega_0=30.0, *, tile_m=None, use_bf16=True):
    """SIREN sine layer forward.

    x:      [..., in_features]
    weight: [out_features, in_features]  (PyTorch nn.Linear layout)
    bias:   [out_features]
    """
    orig_shape = x.shape
    out_features, in_features = weight.shape
    out_dtype = x.dtype

    # ---- fold omega_0 into the (tiny) weight / bias once
    wt = weight.T.astype(jnp.float32) * jnp.float32(omega_0)     # [K, N]
    b = bias.astype(jnp.float32) * jnp.float32(omega_0)          # [N]

    x2d = x.reshape(-1, in_features)
    M = x2d.shape[0]

    # ---- matmul operand dtype (keep accumulation + sin in f32 either way)
    in_dtype = jnp.bfloat16 if use_bf16 else jnp.float32
    in_bytes = np.dtype(in_dtype).itemsize
    out_bytes = np.dtype(out_dtype).itemsize
    sublane = 16 if in_dtype == jnp.bfloat16 else 8

    # ---- lane-dense feature dims
    K_pad = _round_up(in_features, _LANE)
    N_pad = _round_up(out_features, _LANE)

    # ---- VMEM-aware row tile (double-buffered input + output tiles + weight)
    if tile_m is None:
        weight_bytes = 2 * K_pad * N_pad * in_bytes + 2 * N_pad * 4
        per_row = 2 * (K_pad * in_bytes + N_pad * out_bytes)
        tile_m = max(sublane, (_VMEM_TILE_BUDGET - weight_bytes) // per_row)
        tile_m = min(_MAX_TILE_M, tile_m)
    tile_m = max(sublane, (int(tile_m) // sublane) * sublane)
    tile_m = min(tile_m, _round_up(max(M, 1), sublane))   # don't over-tile tiny M

    M_pad = _round_up(max(M, 1), tile_m)
    grid_m = M_pad // tile_m

    # ---- pad operands (zero K-pad rows of Wt keep real outputs exact;
    #      zero N-pad cols / bias give sin(0)=0 garbage we slice off)
    x_p = jnp.zeros((M_pad, K_pad), dtype=in_dtype)
    x_p = x_p.at[:M, :in_features].set(x2d.astype(in_dtype))
    wt_p = jnp.zeros((K_pad, N_pad), dtype=in_dtype)
    wt_p = wt_p.at[:in_features, :out_features].set(wt.astype(in_dtype))
    b_p = jnp.zeros((1, N_pad), dtype=jnp.float32)
    b_p = b_p.at[:, :out_features].set(b[None, :])

    # ---- explicit scoped-VMEM limit (safe on v5e 16 MiB / v7x 32 MiB defaults)
    vmem_needed = (2 * tile_m * K_pad * in_bytes      # x tile, double-buffered
                   + 2 * K_pad * N_pad * in_bytes     # weight (conservative x2)
                   + 2 * N_pad * 4                    # bias
                   + 2 * tile_m * N_pad * out_bytes)  # out tile, double-buffered
    vmem_limit = int(min(max(2 * vmem_needed, 8 << 20) + (4 << 20), 60 << 20))

    cost = pl.CostEstimate(
        flops=2 * M_pad * K_pad * N_pad,
        transcendentals=M_pad * N_pad,
        bytes_accessed=(M_pad * K_pad * in_bytes + K_pad * N_pad * in_bytes
                        + N_pad * 4 + M_pad * N_pad * out_bytes),
    )

    out = pl.pallas_call(
        _sine_layer_kernel,
        out_shape=jax.ShapeDtypeStruct((M_pad, N_pad), out_dtype),
        grid_spec=pltpu.PrefetchScalarGridSpec(
            num_scalar_prefetch=0,
            grid=(grid_m,),
            in_specs=[
                pl.BlockSpec((tile_m, K_pad), lambda i: (i, 0)),
                pl.BlockSpec((K_pad, N_pad), lambda i: (0, 0)),
                pl.BlockSpec((1, N_pad), lambda i: (0, 0)),
            ],
            out_specs=pl.BlockSpec((tile_m, N_pad), lambda i: (i, 0)),
        ),
        compiler_params=pltpu.CompilerParams(
            dimension_semantics=("parallel",),   # rows shard across TCs (v7x)
            vmem_limit_bytes=vmem_limit,
        ),
        cost_estimate=cost,
    )(x_p, wt_p, b_p)

    out = out[:M, :out_features]
    return out.reshape(*orig_shape[:-1], out_features)


def init_sine_layer_params(key, in_features, out_features, is_first=False, omega_0=30.0):
    """Deterministic SIREN init matching the PyTorch module's init_weights()."""
    kw, kb = jax.random.split(key)
    if is_first:
        bound_w = 1.0 / in_features
    else:
        bound_w = np.sqrt(6.0 / in_features) / omega_0
    weight = jax.random.uniform(
        kw, (out_features, in_features), dtype=jnp.float32,
        minval=-bound_w, maxval=bound_w)
    # nn.Linear default bias init: U(-1/sqrt(in), 1/sqrt(in))
    bound_b = 1.0 / np.sqrt(in_features)
    bias = jax.random.uniform(
        kb, (out_features,), dtype=jnp.float32,
        minval=-bound_b, maxval=bound_b)
    return weight, bias


if __name__ == "__main__":
    key = jax.random.PRNGKey(0)
    k_x, k_p, k_x2, k_p2 = jax.random.split(key, 4)
    omega_0 = 30.0

    # ---- case 1: small shapes matching the module spec (first SIREN layer)
    batch, seq, in_features, out_features = 2, 8, 32, 32
    x = jax.random.normal(k_x, (batch, seq, in_features), dtype=jnp.float32)
    weight, bias = init_sine_layer_params(
        k_p, in_features, out_features, is_first=True, omega_0=omega_0)
    ref = jnp.sin(omega_0 * (x @ weight.T + bias))

    out_f32 = jax.block_until_ready(
        sine_layer_forward(x, weight, bias, omega_0=omega_0, use_bf16=False))
    np.testing.assert_allclose(np.asarray(out_f32), np.asarray(ref),
                               atol=1e-4, rtol=1e-4)

    out_bf16 = jax.block_until_ready(
        sine_layer_forward(x, weight, bias, omega_0=omega_0, use_bf16=True))
    np.testing.assert_allclose(np.asarray(out_bf16), np.asarray(ref),
                               atol=1e-1, rtol=1e-1)

    # ---- case 2: non-aligned shapes exercising M padding, K/N lane padding
    #      and multi-step tiling (hidden SIREN layer)
    batch2, seq2, in2, out2 = 2, 1000, 48, 80    # M = 2000, not tile-aligned
    x2 = jax.random.normal(k_x2, (batch2, seq2, in2), dtype=jnp.float32)
    w2, b2 = init_sine_layer_params(k_p2, in2, out2, is_first=False, omega_0=omega_0)
    ref2 = jnp.sin(omega_0 * (x2 @ w2.T + b2))

    out2_f32 = jax.block_until_ready(
        sine_layer_forward(x2, w2, b2, omega_0=omega_0, use_bf16=False, tile_m=512))
    np.testing.assert_allclose(np.asarray(out2_f32), np.asarray(ref2),
                               atol=1e-4, rtol=1e-4)

    out2_bf16 = jax.block_until_ready(
        sine_layer_forward(x2, w2, b2, omega_0=omega_0, use_bf16=True))
    np.testing.assert_allclose(np.asarray(out2_bf16), np.asarray(ref2),
                               atol=1e-1, rtol=1e-1)

    print("KERNEL_OK")
</pallas_src>

<mosaic_0001>
module attributes {stable_mosaic.version = 11 : i64} {
  func.func @_sine_layer_kernel(%arg0: i32, %arg1: memref<16x128xf32, #tpu.memory_space<vmem>>, %arg2: memref<128x128xf32, #tpu.memory_space<vmem>>, %arg3: memref<1x128xf32, #tpu.memory_space<vmem>>, %arg4: memref<16x128xf32, #tpu.memory_space<vmem>>) attributes {dimension_semantics = [#tpu.dimension_semantics<parallel>], iteration_bounds = array<i64: 1>, scalar_prefetch = 0 : i64, scratch_operands = 0 : i64, tpu.core_type = #tpu.core_type<tc>, window_params = [{transform_indices = @transform_0, window_bounds = array<i64: 16, 128>}, {pipeline_mode = #tpu.pipeline_mode<synchronous>, transform_indices = @transform_1, window_bounds = array<i64: 128, 128>}, {pipeline_mode = #tpu.pipeline_mode<synchronous>, transform_indices = @transform_2, window_bounds = array<i64: 1, 128>}, {transform_indices = @transform_3, window_bounds = array<i64: 16, 128>}]} {
    %c0 = arith.constant 0 : index
    %c0_0 = arith.constant 0 : index
    %0 = vector.load %arg1[%c0, %c0_0] : memref<16x128xf32, #tpu.memory_space<vmem>>, vector<16x128xf32>
    %c0_1 = arith.constant 0 : index
    %c0_2 = arith.constant 0 : index
    %1 = vector.load %arg2[%c0_1, %c0_2] : memref<128x128xf32, #tpu.memory_space<vmem>>, vector<128x128xf32>
    %cst = arith.constant dense<0.000000e+00> : vector<16x128xf32>
    %2 = tpu.matmul %0, %1, %cst {dimension_numbers = #tpu.dot_dimension_numbers<[1], [0], [0], [1], [0, 0, 1, 1], [], []>} : vector<16x128xf32>, vector<128x128xf32>, vector<16x128xf32> -> vector<16x128xf32>
    %c0_3 = arith.constant 0 : index
    %c0_4 = arith.constant 0 : index
    %3 = vector.load %arg3[%c0_3, %c0_4] : memref<1x128xf32, #tpu.memory_space<vmem>>, vector<1x128xf32>
    %4 = vector.broadcast %3 : vector<1x128xf32> to vector<16x128xf32>
    %5 = arith.addf %2, %4 : vector<16x128xf32>
    %6 = math.sin %5 : vector<16x128xf32>
    %c0_5 = arith.constant 0 : index
    %c0_6 = arith.constant 0 : index
    %7 = vector.load %arg4[%c0_5, %c0_6] : memref<16x128xf32, #tpu.memory_space<vmem>>, vector<16x128xf32>
    tpu.vector_store %arg4[%c0_5, %c0_6], %6 {strides = array<i32>} : memref<16x128xf32, #tpu.memory_space<vmem>>, vector<16x128xf32>,
    return
  }
  func.func @transform_0(%arg0: i32) -> (i32, i32) {
    %c0_i32 = arith.constant 0 : i32
    %c0_i32_0 = arith.constant 0 : i32
    return %arg0, %c0_i32 : i32, i32
  }
  func.func @transform_1(%arg0: i32) -> (i32, i32) {
    %c0_i32 = arith.constant 0 : i32
    %c0_i32_0 = arith.constant 0 : i32
    %c0_i32_1 = arith.constant 0 : i32
    return %c0_i32, %c0_i32_0 : i32, i32
  }
  func.func @transform_2(%arg0: i32) -> (i32, i32) {
    %c0_i32 = arith.constant 0 : i32
    %c0_i32_0 = arith.constant 0 : i32
    %c0_i32_1 = arith.constant 0 : i32
    return %c0_i32, %c0_i32_0 : i32, i32
  }
  func.func @transform_3(%arg0: i32) -> (i32, i32) {
    %c0_i32 = arith.constant 0 : i32
    %c0_i32_0 = arith.constant 0 : i32
    return %arg0, %c0_i32 : i32, i32
  }
}

</mosaic_0001>

<bundles_post_ra>
// kernel: tpu_custom_call.1
= control target key start
LH: loop header
LB: loop body
LE: loop exit
PB: predicated region body
PF: predicated region fallthrough
CT: control target
= control target key end

     0   :  { %8 = vsyncpa [#allocation3], 0  ;;  %s647_s0 = inlined_call_operand.hbm [shape: f32[16,128], index: 0, kind: input, shape index: {}]   ;;  %s648_s1 = inlined_call_operand.hbm [shape: f32[128,128], index: 1, kind: input, shape index: {}]   ;;  %s649_s2 = inlined_call_operand.vmem [shape: f32[1,128], index: 2, kind: input, shape index: {}]   ;;  %s650_s3 = inlined_call_operand.hbm [shape: f32[16,128], index: 3, kind: output, shape index: {}]  }
   0x1   :  { %9 = vsyncpa [#allocation6], 0 }
   0x2   :  { %10 = vsyncpa [#allocation4], 0  ;;  %s526_s12 = smov [#allocation2]  }
   0x3   :  { %s16_s13 = sshll.u32 %s526_s12, 4  ;;  %s17_s13 = int_to_ptr.vmem [resolvable:$true] %s16_s13 }
   0x4   :  { %s468_s14 = scalar_lea.vmem %s17_s13, 256  ;;  %p473_p1 = scmp.lt.s32.totalorder %s17_s13, %s17_s13 }
   0x5   :  { %p469_p0 = scmp.ne.s32.totalorder %s17_s13, %s468_s14  ;;  %p474_p2 = scmp.lt.s32.totalorder %s468_s14, %s468_s14 }
   0x7   :  { %p475_p3 = por %p474_p2, %p473_p1 }
   0x9   :  { %p476_p4 = pnand %p475_p3, %p469_p0 }
   0xb   :  { %479 = shalt.err (!%p476_p4)
}
   0xc   :  { %s527_s15 = smov 128   ;;  %s528_s16 = smov 8  }
   0xd   :  { %22 = dma.hbm_to_vmem [thread:$0]  %s647_s0, 256, %s17_s13, [#allocation3], %s527_s15, %s527_s15, %s528_s16  }
   0xe   :  { %s529_s19 = smov [#allocation5]  }
   0xf   :  { %s28_s20 = sshll.u32 %s529_s19, 4  ;;  %s29_s20 = int_to_ptr.vmem [resolvable:$true] %s28_s20 }
  0x10   :  { %s488_s21 = scalar_lea.vmem %s29_s20, 2048  ;;  %p493_p6 = scmp.lt.s32.totalorder %s29_s20, %s29_s20 }
  0x11   :  { %p489_p5 = scmp.ne.s32.totalorder %s29_s20, %s488_s21  ;;  %p494_p7 = scmp.lt.s32.totalorder %s488_s21, %s488_s21 }
  0x13   :  { %p495_p8 = por %p494_p7, %p493_p6 }
  0x15   :  { %p496_p9 = pnand %p495_p8, %p489_p5 }
  0x17   :  { %499 = shalt.err (!%p496_p9)
}
  0x18   :  { %34 = dma.hbm_to_vmem [thread:$0]  %s648_s1, 2048, %s29_s20, [#allocation6], %s527_s15, %s527_s15, %s528_s16  }
  0x19   :  { %520 = dma.done.wait [#allocation3], 256  }
  0x1a   :  { %521 = vsyncadd [#allocation3], 4294967040 }
  0x1b   :  { %522 = dma.done.wait [#allocation6], 2048  }
  0x1c   :  { %523 = vsyncadd [#allocation6], 4294965248  ;;  %v60_v0 = vld [vmem:[#allocation5 + $0x78] sm:$0xff]  ;;  %v59_v1 = vld [vmem:[#allocation5 + $0x70] sm:$0xff]  ;;  %v530_v41 = vmov 683565275  }
  0x1d   :  { %398 = vmatprep.subr.mxu0 %v60_v0  ;;  %v58_v2 = vld [vmem:[#allocation5 + $0x68] sm:$0xff]  ;;  %v57_v3 = vld [vmem:[#allocation5 + $0x60] sm:$0xff]  ;;  %v43_v4 = vld [vmem:[#allocation2] sm:$0xff]  ;;  %v531_v44 = vmov 2475754826  }
  0x1e   :  { %399 = vmatpush3.msra.mxu0 %v60_v0  ;;  %v56_v5 = vld [vmem:[#allocation5 + $0x58] sm:$0xff]  ;;  %430 = vmatprep.mubr.f32.mxu0 %v43_v4  ;;  %v55_v6 = vld [vmem:[#allocation5 + $0x50] sm:$0xff]  ;;  %v54_v7 = vld [vmem:[#allocation5 + $0x48] sm:$0xff]  ;;  %v532_v46 = vmov 2131351028  }
  0x1f   :  { %400 = vmatprep.subr.mxu0 %v59_v1  ;;  %v53_v8 = vld [vmem:[#allocation5 + $0x40] sm:$0xff]  ;;  %v52_v9 = vld [vmem:[#allocation5 + $0x38] sm:$0xff]  ;;  %v51_v10 = vld [vmem:[#allocation5 + $0x30] sm:$0xff]  ;;  %v533_v48 = vmov 2102212464  }
  0x20   :  { %401 = vmatpush3.msra.mxu0 %v59_v1  ;;  %v50_v11 = vld [vmem:[#allocation5 + $0x28] sm:$0xff]  ;;  %v49_v12 = vld [vmem:[#allocation5 + $0x20] sm:$0xff]  ;;  %v48_v13 = vld [vmem:[#allocation5 + $0x18] sm:$0xff]  ;;  %v534_v50 = vmov 920167782  }
  0x21   :  { %402 = vmatprep.subr.mxu0 %v58_v2  ;;  %v47_v14 = vld [vmem:[#allocation5 + $0x10] sm:$0xff]  ;;  %v46_v15 = vld [vmem:[#allocation5 + $0x8] sm:$0xff]  ;;  %v45_v16 = vld [vmem:[#allocation5] sm:$0xff]  ;;  %v535_v57 = vmov 1326507024  }
  0x22   :  { %403 = vmatpush3.msra.mxu0 %v58_v2  ;;  %v44_v17 = vld [vmem:[#allocation2 + $0x8] sm:$0xff]  ;;  %v371_v18 = vld [vmem:[%s649_s2] ss:$0 sm:$0xff]  ;;  %s536_s2 = smov [#allocation7]  }
  0x23   :  { %404 = vmatprep.subr.mxu0 %v57_v3  ;;  %s358_s24 = sshll.u32 %s536_s2, 4  ;;  %s359_s24 = int_to_ptr.vmem [resolvable:$true] %s358_s24 }
  0x24   :  { %405 = vmatpush3.msra.mxu0 %v57_v3  ;;  %s500_s25 = scalar_lea.vmem %s359_s24, 256  ;;  %p505_p11 = scmp.lt.s32.totalorder %s359_s24, %s359_s24 }
  0x25   :  { %406 = vmatprep.subr.mxu0 %v56_v5  ;;  %p501_p10 = scmp.ne.s32.totalorder %s359_s24, %s500_s25  ;;  %p506_p12 = scmp.lt.s32.totalorder %s500_s25, %s500_s25 }
  0x26   :  { %407 = vmatpush3.msra.mxu0 %v56_v5 }
  0x27   :  { %408 = vmatprep.subr.mxu0 %v55_v6  ;;  %p507_p13 = por %p506_p12, %p505_p11 }
  0x28   :  { %409 = vmatpush3.msra.mxu0 %v55_v6 }
  0x29   :  { %410 = vmatprep.subr.mxu0 %v54_v7  ;;  %p508_p0 = pnand %p507_p13, %p501_p10 }
  0x2a   :  { %411 = vmatpush3.msra.mxu0 %v54_v7 }
  0x2b   :  { %412 = vmatprep.subr.mxu0 %v53_v8 }
  0x2c   :  { %413 = vmatpush3.msra.mxu0 %v53_v8 }
  0x2d   :  { %414 = vmatprep.subr.mxu0 %v52_v9 }
  0x2e   :  { %415 = vmatpush3.msra.mxu0 %v52_v9 }
  0x2f   :  { %416 = vmatprep.subr.mxu0 %v51_v10 }
  0x30   :  { %417 = vmatpush3.msra.mxu0 %v51_v10 }
  0x31   :  { %418 = vmatprep.subr.mxu0 %v50_v11 }
  0x32   :  { %419 = vmatpush3.msra.mxu0 %v50_v11 }
  0x33   :  { %420 = vmatprep.subr.mxu0 %v49_v12 }
  0x34   :  { %421 = vmatpush3.msra.mxu0 %v49_v12 }
  0x35   :  { %422 = vmatprep.subr.mxu0 %v48_v13 }
  0x36   :  { %423 = vmatpush3.msra.mxu0 %v48_v13 }
  0x37   :  { %424 = vmatprep.subr.mxu0 %v47_v14 }
  0x38   :  { %425 = vmatpush3.msra.mxu0 %v47_v14 }
  0x39   :  { %426 = vmatprep.subr.mxu0 %v46_v15 }
  0x3a   :  { %427 = vmatpush3.msra.mxu0 %v46_v15 }
  0x3b   :  { %428 = vmatprep.subr.mxu0 %v45_v16 }
  0x3c   :  { %429 = vmatpush3.msra.mxu0 %v45_v16 }
  0x3d   :  { %431 = vmatmul.mubr.f32.vlgmr.msra.gmra.mxu0 %v44_v17 }
  0xfd   :  { %v432_v19 = vpop.f32.mrf.mxu0 }
  0xfe   :  { %v572_v20 = vadd.f32 %v432_v19, %v371_v18 }
  0xff   :  { %v134_v21 = vpop.f32.mrf.mxu0 }
 0x100   :  { %v247_v22 = vand.u32 2147483647, %v572_v20  ;;  %v250_v23 = vand.u32 2139095040, %v572_v20  ;;  %v576_v24 = vadd.f32 %v371_v18, %v134_v21  ;;  %vm249_vm14 = vcmp.lt.s32.totalorder %v572_v20, 0 }
 0x102   :  { %v251_v25 = vshrl.u32 %v250_v23, 23  ;;  %v254_v26 = vand.u32 8388607, %v247_v22  ;;  %v146_v27 = vand.u32 2139095040, %v576_v24  ;;  %v143_v29 = vand.u32 2147483647, %v576_v24 }
 0x103   :  { %vm626_vm15 = vcmp.le.f32.partialorder %v247_v22, 0.7853982 }
 0x104   :  { %v376_v28 = vadd.s32 4294967169, %v251_v25  ;;  %v147_v30 = vshrl.u32 %v146_v27, 23  ;;  %v255_v32 = vor.u32 8388608, %v254_v26  ;;  %v150_v34 = vand.u32 8388607, %v143_v29 }
 0x106   :  { %v257_v31 = vadd.s32 1, %v376_v28  ;;  %v372_v33 = vadd.s32 4294967169, %v147_v30  ;;  %v584_v39 = vshll.u32 %v255_v32, 8  ;;  %v151_v43 = vor.u32 8388608, %v150_v34 }
 0x108   :  { %vm258_vm0 = vcmp.gt.s32.totalorder %v257_v31, 0  ;;  %v153_v36 = vadd.s32 1, %v372_v33  ;;  %v191_v12 = vshll.u32 %v151_v43, 8 }
 0x109   :  { %v259_v35 = vsel %vm258_vm0, %v257_v31, 0  ;;  %vm145_vm0 = vcmp.lt.s32.totalorder %v576_v24, 0 }
 0x10a   :  { %v260_v37 = vshrl.u32 %v259_v35, 5  ;;  %v261_v38 = vand.u32 31, %v259_v35  ;;  %vm154_vm1 = vcmp.gt.s32.totalorder %v153_v36, 0 }
 0x10b   :  { %v155_v62 = vsel %vm154_vm1, %v153_v36, 0  ;;  %vm144_vm1 = vcmp.le.f32.partialorder %v143_v29, 0.7853982 }
 0x10c   :  { %v262_v40 = vsub.s32 32, %v261_v38  ;;  %v264_v42 = vshll.u32 %v530_v41, %v261_v38  ;;  %v267_v45 = vshll.u32 %v531_v44, %v261_v38  ;;  %v270_v47 = vshll.u32 %v532_v46, %v261_v38 }
 0x10d   :  { %v273_v49 = vshll.u32 %v533_v48, %v261_v38  ;;  %v276_v51 = vshll.u32 %v534_v50, %v261_v38  ;;  %vm279_vm2 = vcmp.lt.s32.totalorder %v260_v37, 1  ;;  %vm281_vm3 = vcmp.lt.s32.totalorder %v260_v37, 3 }
 0x10e   :  { %v265_v52 = vshrl.u32 %v531_v44, %v262_v40  ;;  %v268_v53 = vshrl.u32 %v532_v46, %v262_v40  ;;  %v271_v54 = vshrl.u32 %v533_v48, %v262_v40  ;;  %v263_v55 = vshrl.u32 %v530_v41, %v262_v40 }
 0x10f   :  { %v274_v56 = vshrl.u32 %v534_v50, %v262_v40  ;;  %v277_v58 = vshrl.u32 %v535_v57, %v262_v40  ;;  %vm282_vm4 = vcmp.lt.s32.totalorder %v260_v37, 4  ;;  %v157_v1 = vand.u32 31, %v155_v62 }
 0x110   :  { %v266_v59 = vor.u32 %v265_v52, %v264_v42  ;;  %v269_v60 = vor.u32 %v268_v53, %v267_v45  ;;  %v272_v61 = vor.u32 %v271_v54, %v270_v47  ;;  %vm280_vm5 = vcmp.lt.s32.totalorder %v260_v37, 2 }
 0x111   :  { %v275_v63 = vor.u32 %v274_v56, %v273_v49  ;;  %v278_v0 = vor.u32 %v277_v58, %v276_v51  ;;  %v158_v9 = vsub.s32 32, %v157_v1  ;;  %v156_v16 = vshrl.u32 %v155_v62, 5 }
 0x112   :  { %v283_v2 = vsel %vm279_vm2, %v263_v55, %v266_v59  ;;  %v284_v3 = vsel %vm282_vm4, %v272_v61, 2102212464  ;;  %v287_v4 = vsel %vm279_vm2, %v266_v59, %v269_v60  ;;  %v291_v5 = vsel %vm279_vm2, %v269_v60, %v272_v61 }
 0x113   :  { %v285_v6 = vsel %vm281_vm3, %v269_v60, %v284_v3  ;;  %v288_v7 = vsel %vm282_vm4, %v275_v63, 920167782  ;;  %v292_v8 = vsel %vm282_vm4, %v278_v0, 1326507024  ;;  %v160_v23 = vshll.u32 %v530_v41, %v157_v1 }
 0x114   :  { %v289_v10 = vsel %vm281_vm3, %v272_v61, %v288_v7  ;;  %v293_v11 = vsel %vm281_vm3, %v275_v63, %v292_v8  ;;  %v286_v13 = vsel %vm280_vm5, %v283_v2, %v285_v6  ;;  %v161_v25 = vshrl.u32 %v531_v44, %v158_v9 }
 0x115   :  { %v290_v14 = vsel %vm280_vm5, %v287_v4, %v289_v10  ;;  %v294_v15 = vsel %vm280_vm5, %v291_v5, %v293_v11  ;;  %v163_v26 = vshll.u32 %v531_v44, %v157_v1  ;;  %v164_v27 = vshrl.u32 %v532_v46, %v158_v9 }
 0x116   :  { %v596_v17 = vmul.u32.u64.low %v584_v39, %v294_v15  ;;  %v597_v18 = vmul.u32.u64.high %v584_v39, %v294_v15, %v596_v17  ;;  %v600_v19 = vmul.u32.u64.low %v584_v39, %v290_v14  ;;  %v601_v21 = vmul.u32.u64.high %v584_v39, %v290_v14, %v600_v19 }
 0x117   :  { %v166_v28 = vshll.u32 %v532_v46, %v157_v1  ;;  %v167_v30 = vshrl.u32 %v533_v48, %v158_v9  ;;  %v169_v31 = vshll.u32 %v533_v48, %v157_v1  ;;  %v170_v32 = vshrl.u32 %v534_v50, %v158_v9 }
 0x118   :  { %v162_v33 = vor.u32 %v161_v25, %v160_v23  ;;  %v165_v34 = vor.u32 %v164_v27, %v163_v26  ;;  %v172_v35 = vshll.u32 %v534_v50, %v157_v1  ;;  %v173_v36 = vshrl.u32 %v535_v57, %v158_v9 }
 0x119   :  { %v302_v37 = vmul.u32 %v584_v39, %v286_v13  ;;  %vm304_vm6 = vc.u32 %v597_v18, %v600_v19  ;;  %v305_v38 = vadd.s32 1, %v601_v21  ;;  %v168_v40 = vor.u32 %v167_v30, %v166_v28 }
 0x11a   :  { %v159_v42 = vshrl.u32 %v530_v41, %v158_v9  ;;  %v171_v43 = vor.u32 %v170_v32, %v169_v31  ;;  %v174_v44 = vor.u32 %v173_v36, %v172_v35  ;;  %vm175_vm7 = vcmp.lt.s32.totalorder %v156_v16, 1 }
 0x11b   :  { %v306_v45 = vsel %vm304_vm6, %v305_v38, %v601_v21  ;;  %vm177_vm8 = vcmp.lt.s32.totalorder %v156_v16, 3  ;;  %vm178_vm9 = vcmp.lt.s32.totalorder %v156_v16, 4  ;;  %v183_v46 = vsel %vm175_vm7, %v162_v33, %v165_v34 }
 0x11c   :  { %v307_v47 = vadd.s32 %v306_v45, %v302_v37  ;;  %v180_v48 = vsel %vm178_vm9, %v168_v40, 2102212464  ;;  %v184_v49 = vsel %vm178_vm9, %v171_v43, 920167782  ;;  %v187_v39 = vsel %vm175_vm7, %v165_v34, %v168_v40 }
 0x11d   :  { %vm176_vm10 = vcmp.lt.s32.totalorder %v156_v16, 2  ;;  %v179_v50 = vsel %vm175_vm7, %v159_v42, %v162_v33  ;;  %v185_v51 = vsel %vm177_vm8, %v168_v40, %v184_v49  ;;  %v188_v52 = vsel %vm178_vm9, %v174_v44, 1326507024 }
 0x11e   :  { %v308_v53 = vadd.s32 536870912, %v307_v47  ;;  %v181_v54 = vsel %vm177_vm8, %v165_v34, %v180_v48  ;;  %v186_v55 = vsel %vm176_vm10, %v183_v46, %v185_v51  ;;  %v189_v41 = vsel %vm177_vm8, %v171_v43, %v188_v52 }
 0x11f   :  { %v190_v56 = vsel %vm176_vm10, %v187_v39, %v189_v41  ;;  %v611_v57 = vmul.u32.u64.low %v191_v12, %v186_v55  ;;  %v612_v58 = vmul.u32.u64.high %v191_v12, %v186_v55, %v611_v57  ;;  %v182_v62 = vsel %vm176_vm10, %v179_v50, %v181_v54 }
 0x120   :  { %v309_v59 = vshrl.u32 %v308_v53, 30  ;;  %v614_v60 = vmul.u32.u64.low %v191_v12, %v190_v56  ;;  %v615_v61 = vmul.u32.u64.high %v191_v12, %v190_v56, %v614_v60  ;;  %v198_v2 = vmul.u32 %v191_v12, %v182_v62 }
 0x121   :  { %v201_v0 = vadd.s32 1, %v612_v58  ;;  %v303_v15 = vadd.s32 %v600_v19, %v597_v18  ;;  %vm339_vm5 = vweird.f32 %v572_v20  ;;  %vm235_vm9 = vweird.f32 %v576_v24 }
 0x122   :  { %v310_v63 = vshll.u32 %v309_v59, 30  ;;  %vm200_vm11 = vc.u32 %v615_v61, %v611_v57  ;;  %v199_v37 = vadd.s32 %v611_v57, %v615_v61  ;;  %v333_v44 = vsub.s32 4, %v309_v59 }
 0x123   :  { %v202_v3 = vsel %vm200_vm11, %v201_v0, %v612_v58 }
 0x124   :  { %v311_v1 = vsub.s32 %v307_v47, %v310_v63  ;;  %v203_v5 = vadd.s32 %v202_v3, %v198_v2  ;;  %v334_v50 = vsel %vm249_vm14, %v333_v44, %v309_v59 }
 0x125   :  { %v336_v22 = vsel %vm626_vm15, 0, %v334_v50 }
 0x126   :  { %v313_v4 = vsub.s32 0, %v311_v1  ;;  %v204_v7 = vadd.s32 536870912, %v203_v5  ;;  %v340_v41 = vadd.s32 3, %v336_v22 }
 0x128   :  { %v377_v6 = vmin.u32 %v313_v4, %v311_v1  ;;  %v205_v9 = vshrl.u32 %v204_v7, 30  ;;  %v341_v59 = vand.u32 3, %v340_v41 }
 0x12a   :  { %v315_v8 = vclz %v377_v6  ;;  %v206_v11 = vshll.u32 %v205_v9, 30  ;;  %v229_v55 = vsub.s32 4, %v205_v9  ;;  %vm346_vm2 = vcmp.eq.s32.totalorder %v341_v59, 2 }
 0x12b   :  { %vm343_vm3 = vcmp.eq.s32.totalorder %v341_v59, 0  ;;  %vm342_vm4 = vcmp.lt.s32.totalorder %v341_v59, 2 }
 0x12c   :  { %v378_v10 = vadd.s32 4294967294, %v315_v8  ;;  %v207_v13 = vsub.s32 %v203_v5, %v206_v11  ;;  %v230_v58 = vsel %vm145_vm0, %v229_v55, %v205_v9 }
 0x12d   :  { %v232_v62 = vsel %vm144_vm1, 0, %v230_v58 }
 0x12e   :  { %vm379_vm12 = vcmp.lt.s32.totalorder %v378_v10, 0  ;;  %v209_v17 = vsub.s32 0, %v207_v13  ;;  %v236_v2 = vadd.s32 3, %v232_v62 }
 0x12f   :  { %v318_v14 = vsel %vm379_vm12, 0, %v378_v10 }
 0x130   :  { %v319_v16 = vsub.s32 32, %v318_v14  ;;  %v323_v12 = vsub.s32 4294967266, %v318_v14  ;;  %v320_v21 = vshll.u32 %v311_v1, %v318_v14  ;;  %v373_v26 = vmin.u32 %v209_v17, %v207_v13 }
 0x131   :  { %v237_v5 = vand.u32 3, %v236_v2 }
 0x132   :  { %v321_v23 = vshrl.u32 %v303_v15, %v319_v16  ;;  %v324_v25 = vadd.s32 127, %v323_v12  ;;  %v211_v30 = vclz %v373_v26 }
 0x133   :  { %vm242_vm6 = vcmp.eq.s32.totalorder %v237_v5, 2  ;;  %vm239_vm7 = vcmp.eq.s32.totalorder %v237_v5, 0  ;;  %vm238_vm8 = vcmp.lt.s32.totalorder %v237_v5, 2 }
 0x134   :  { %v322_v27 = vor.u32 %v321_v23, %v320_v21  ;;  %v325_v28 = vshll.u32 %v324_v25, 23  ;;  %v374_v32 = vadd.s32 4294967294, %v211_v30 }
 0x136   :  { %v326_v31 = vor.u32 4788187, %v325_v28  ;;  %v329_v34 = vcvt.s32.f32 %v322_v27  ;;  %vm375_vm13 = vcmp.lt.s32.totalorder %v374_v32, 0 }
 0x137   :  { %v214_v35 = vsel %vm375_vm13, 0, %v374_v32 }
 0x138   :  { %v327_v33 = vand.u32 2147483647, %v326_v31  ;;  %v215_v18 = vsub.s32 32, %v214_v35  ;;  %v219_v19 = vsub.s32 4294967266, %v214_v35  ;;  %v216_v40 = vshll.u32 %v207_v13, %v214_v35 }
 0x13a   :  { %v330_v36 = vmul.f32 %v329_v34, %v327_v33  ;;  %v217_v42 = vshrl.u32 %v199_v37, %v215_v18  ;;  %v220_v43 = vadd.s32 127, %v219_v19 }
 0x13c   :  { %v331_v38 = vxor.u32 2147483648, %v330_v36  ;;  %v218_v47 = vor.u32 %v217_v42, %v216_v40  ;;  %v221_v48 = vshll.u32 %v220_v43, 23 }
 0x13e   :  { %v332_v46 = vsel %vm249_vm14, %v331_v38, %v330_v36  ;;  %v222_v39 = vor.u32 4788187, %v221_v48  ;;  %v225_v52 = vcvt.s32.f32 %v218_v47 }
 0x13f   :  { %v335_v49 = vsel %vm626_vm15, %v572_v20, %v332_v46 }
 0x140   :  { %452 = vcosq.f32 %v335_v49  ;;  %v223_v51 = vand.u32 2147483647, %v222_v39 }
 0x141   :  { %454 = vsinq.f32 %v335_v49 }
 0x142   :  { %v226_v53 = vmul.f32 %v225_v52, %v223_v51 }
 0x144   :  { %v227_v54 = vxor.u32 2147483648, %v226_v53 }
 0x146   :  { %v228_v56 = vsel %vm145_vm0, %v227_v54, %v226_v53 }
 0x147   :  { %v231_v57 = vsel %vm144_vm1, %v576_v24, %v228_v56 }
 0x148   :  { %456 = vcosq.f32 %v231_v57 }
 0x149   :  { %458 = vsinq.f32 %v231_v57 }
 0x14d   :  { %v453_v60 = vpop.eup %452 }
 0x14e   :  { %v455_v61 = vpop.eup %454  ;;  %v347_v63 = vxor.u32 2147483648, %v453_v60 }
 0x14f   :  { %v344_v0 = vxor.u32 2147483648, %v455_v61 }
 0x150   :  { %v348_v1 = vsel %vm346_vm2, %v347_v63, %v455_v61 }
 0x151   :  { %v345_v3 = vsel %vm343_vm3, %v453_v60, %v344_v0 }
 0x152   :  { %v349_v29 = vsel %vm342_vm4, %v345_v3, %v348_v1 }
 0x153   :  { %v350_v4 = vsel %vm339_vm5, nan, %v349_v29 }
 0x154   :  { %352 = vst [vmem:[#allocation7 + $0x8] sm:$0xff] %v350_v4 }
 0x155   :  { %v457_v6 = vpop.eup %456 }
 0x156   :  { %v459_v7 = vpop.eup %458  ;;  %v243_v8 = vxor.u32 2147483648, %v457_v6 }
 0x157   :  { %v240_v9 = vxor.u32 2147483648, %v459_v7 }
 0x158   :  { %v244_v10 = vsel %vm242_vm6, %v243_v8, %v459_v7 }
 0x159   :  { %v241_v11 = vsel %vm239_vm7, %v457_v6, %v240_v9 }
 0x15a   :  { %v245_v13 = vsel %vm238_vm8, %v241_v11, %v244_v10 }
 0x15b   :  { %v246_v20 = vsel %vm235_vm9, nan, %v245_v13 }
 0x15c   :  { %351 = vst [vmem:[#allocation7] sm:$0xff] %v246_v20 }
 0x15d   :  { %511 = shalt.err (!%p508_p0)
}
 0x15e   :  { %364 = dma.vmem_to_hbm [thread:$0]  %s359_s24, 256, %s650_s3, [#allocation4], %s527_s15, %s527_s15, %s528_s16  }
 0x15f   :  { %524 = dma.done.wait [#allocation4], 256  }
 0x160   :  { %525 = vsyncadd [#allocation4], 4294967040 }
 0x161   :  { %368 = vsyncpa [#allocation3], 1 }
 0x162   :  { %369 = vsyncpa [#allocation6], 1 }
 0x163   :  { %370 = vsyncpa [#allocation4], 1 }

</bundles_post_ra>
